<compile_context>
chip_gen: v7x
topology: tpu7x:2x2x1
jax: 0.10.0
libtpu: 0.0.40
codegen_flags: <defaults>
</compile_context>

<pallas_src>
import jax
import jax.numpy as jnp
from jax.experimental import pallas as pl
from jax.experimental.pallas import tpu as pltpu

EPS = 1e-6


def _round_up(x, m):
    return ((x + m - 1) // m) * m


def _final_layer_kernel(x_ref, w_ref, b_ref, o_ref):
    # x_ref: (tm, H)   w_ref: (H, O) pre-transposed, in the matmul dtype
    # b_ref: (1, O) f32   o_ref: (tm, O)
    x = x_ref[...].astype(jnp.float32)

    # LayerNorm (no elementwise affine), biased variance -> matches torch.nn.LayerNorm.
    # Single-pass moments: var = E[x^2] - mean^2 (clamped for numerical safety).
    mean = jnp.mean(x, axis=-1, keepdims=True)
    mean_sq = jnp.mean(x * x, axis=-1, keepdims=True)
    var = jnp.maximum(mean_sq - mean * mean, 0.0)
    inv = jax.lax.rsqrt(var + EPS)
    xn = ((x - mean) * inv).astype(w_ref.dtype)

    # Linear: y = xn @ W^T + b.  MXU matmul with f32 accumulation.
    y = jnp.dot(xn, w_ref[...], preferred_element_type=jnp.float32)
    o_ref[...] = (y + b_ref[...]).astype(o_ref.dtype)


def _vmem_need(t, H, O, x_item, out_item, w_item):
    return (2 * t * H * x_item        # double-buffered x tiles
            + 3 * t * H * 4           # f32 LN intermediates (x cast, x*x, normalized)
            + t * O * 4               # f32 matmul result before output cast
            + 2 * t * O * out_item    # double-buffered output tiles
            + 2 * H * O * w_item      # W^T (worst case: double-buffered fallback)
            + 2 * O * 4               # bias (f32)
            + (2 << 20))              # headroom


def vit_final_layer(x, weight, bias, *, tm=1024, matmul_dtype=None):
    """x: (B, N, H); weight: (O, H) torch-style; bias: (O,). Returns (B, N, O).

    matmul_dtype: dtype used for the MXU operands (defaults to x.dtype). Pass
    jnp.bfloat16 explicitly for f32 activations if the 3-6x faster bf16 MXU path
    is acceptable for the projection precision.
    """
    B, N, H = x.shape
    O = weight.shape[0]
    M = B * N

    x2 = x.reshape(M, H)

    # One-time weight/bias prep (no per-step casts inside the kernel).
    mm_dtype = jnp.dtype(x.dtype) if matmul_dtype is None else jnp.dtype(matmul_dtype)
    wT = weight.T.astype(mm_dtype)                     # (H, O)
    b2 = bias.astype(jnp.float32).reshape(1, O)        # (1, O) f32

    x_item = jnp.dtype(x.dtype).itemsize
    out_item = x_item
    w_item = jnp.dtype(mm_dtype).itemsize

    # Generation-aware VMEM capacity (v7x: 64 MiB/TC vs 128 MiB on v5e/v6e).
    try:
        vmem_cap = int(pltpu.get_tpu_info().vmem_capacity_bytes)
    except Exception:
        vmem_cap = 64 * 1024 * 1024

    # Row tile: big by default, shrunk for small inputs, multiple of 8 sublanes.
    tm_eff = min(tm, _round_up(M, 8))
    # v7x megacore: ensure >= 2 grid steps when there is more than one tile of rows.
    if M > 8 and tm_eff >= M:
        tm_eff = _round_up((M + 1) // 2, 8)
    # Shrink the tile until its VMEM footprint fits this device's capacity.
    budget = max(vmem_cap - (8 << 20), 16 << 20)
    while tm_eff > 8 and _vmem_need(tm_eff, H, O, x_item, out_item, w_item) > budget:
        tm_eff = _round_up(tm_eff // 2, 8)

    vmem_limit = int(min(max(_vmem_need(tm_eff, H, O, x_item, out_item, w_item),
                             32 * 1024 * 1024),
                         vmem_cap))

    grid = (pl.cdiv(M, tm_eff),)   # uneven grid: tail block masked on writeback

    def _run(single_buffer_weights):
        if single_buffer_weights:
            w_spec = pl.BlockSpec((H, O), lambda i: (0, 0), pipeline_mode=pl.Buffered(1))
            b_spec = pl.BlockSpec((1, O), lambda i: (0, 0), pipeline_mode=pl.Buffered(1))
        else:
            w_spec = pl.BlockSpec((H, O), lambda i: (0, 0))
            b_spec = pl.BlockSpec((1, O), lambda i: (0, 0))
        return pl.pallas_call(
            _final_layer_kernel,
            out_shape=jax.ShapeDtypeStruct((M, O), x.dtype),
            grid=grid,
            in_specs=[
                pl.BlockSpec((tm_eff, H), lambda i: (i, 0)),   # x row tile
                w_spec,                                        # resident W^T
                b_spec,                                        # resident bias
            ],
            out_specs=pl.BlockSpec((tm_eff, O), lambda i: (i, 0)),
            compiler_params=pltpu.CompilerParams(
                dimension_semantics=("parallel",),
                vmem_limit_bytes=vmem_limit,
            ),
        )(x2, wT, b2)

    # TODO(synk): sweep pl.Buffered(3) on the x input spec on v7x when VMEM headroom allows.
    try:
        out = _run(True)
    except Exception:
        # Fallback if this jax version rejects pipeline_mode / Buffered(1).
        out = _run(False)

    return out.reshape(B, N, O)


def _reference(x, weight, bias):
    xf = x.astype(jnp.float32)
    mean = jnp.mean(xf, axis=-1, keepdims=True)
    var = jnp.mean((xf - mean) ** 2, axis=-1, keepdims=True)
    xn = (xf - mean) * jax.lax.rsqrt(var + EPS)
    return (xn @ weight.T.astype(jnp.float32) + bias.astype(jnp.float32)).astype(x.dtype)


if __name__ == "__main__":
    key = jax.random.PRNGKey(0)

    # Primary check: B=2, N=8, hidden=32, out=64.
    B, N, hidden, out_size = 2, 8, 32, 64
    kx, kw, kb = jax.random.split(key, 3)
    x = jax.random.normal(kx, (B, N, hidden), dtype=jnp.float32)
    weight = jax.random.normal(kw, (out_size, hidden), dtype=jnp.float32) * 0.02  # torch (out, in)
    bias = jax.random.normal(kb, (out_size,), dtype=jnp.float32) * 0.01

    y = jax.block_until_ready(vit_final_layer(x, weight, bias))
    y_ref = _reference(x, weight, bias)
    assert y.shape == (B, N, out_size)
    assert jnp.allclose(y, y_ref, atol=1e-4, rtol=1e-4), "mismatch vs pure-JAX reference"

    # Secondary check: row count not a multiple of 8 (exercises the uneven-grid tail masking)
    # and a non-128-aligned out_size (masked tail-lane stores).
    B2, N2, hidden2, out2 = 2, 5, 32, 48
    kx2, kw2, kb2 = jax.random.split(jax.random.PRNGKey(1), 3)
    x_b = jax.random.normal(kx2, (B2, N2, hidden2), dtype=jnp.float32)
    w_b = jax.random.normal(kw2, (out2, hidden2), dtype=jnp.float32) * 0.02
    b_b = jax.random.normal(kb2, (out2,), dtype=jnp.float32) * 0.01

    y_b = jax.block_until_ready(vit_final_layer(x_b, w_b, b_b))
    y_b_ref = _reference(x_b, w_b, b_b)
    assert y_b.shape == (B2, N2, out2)
    assert jnp.allclose(y_b, y_b_ref, atol=1e-4, rtol=1e-4), "mismatch (uneven tail case)"

    print("KERNEL_OK")
</pallas_src>

<mosaic_0001>
module attributes {stable_mosaic.version = 11 : i64} {
  func.func @_final_layer_kernel(%arg0: i32, %arg1: memref<8x32xf32, #tpu.memory_space<vmem>>, %arg2: memref<32x64xf32, #tpu.memory_space<vmem>>, %arg3: memref<1x64xf32, #tpu.memory_space<vmem>>, %arg4: memref<8x64xf32, #tpu.memory_space<vmem>>) attributes {dimension_semantics = [#tpu.dimension_semantics<parallel>], iteration_bounds = array<i64: 2>, scalar_prefetch = 0 : i64, scratch_operands = 0 : i64, tpu.core_type = #tpu.core_type<tc>, window_params = [{transform_indices = @transform_0, window_bounds = array<i64: 8, 32>}, {pipeline_mode = #tpu.pipeline_mode<synchronous>, transform_indices = @transform_1, window_bounds = array<i64: 32, 64>}, {pipeline_mode = #tpu.pipeline_mode<synchronous>, transform_indices = @transform_2, window_bounds = array<i64: 1, 64>}, {transform_indices = @transform_3, window_bounds = array<i64: 8, 64>}]} {
    %c0 = arith.constant 0 : index
    %c0_0 = arith.constant 0 : index
    %0 = vector.load %arg1[%c0, %c0_0] : memref<8x32xf32, #tpu.memory_space<vmem>>, vector<8x32xf32>
    %cst = arith.constant dense<0.000000e+00> : vector<8xf32>
    %1 = vector.multi_reduction <add>, %0, %cst [1] : vector<8x32xf32> to vector<8xf32>
    %2 = vector.shape_cast %1 : vector<8xf32> to vector<8x1xf32>
    %cst_1 = arith.constant 3.200000e+01 : f32
    %3 = vector.broadcast %cst_1 : f32 to vector<8x1xf32>
    %4 = arith.divf %2, %3 : vector<8x1xf32>
    %5 = arith.mulf %0, %0 : vector<8x32xf32>
    %cst_2 = arith.constant dense<0.000000e+00> : vector<8xf32>
    %6 = vector.multi_reduction <add>, %5, %cst_2 [1] : vector<8x32xf32> to vector<8xf32>
    %7 = vector.shape_cast %6 : vector<8xf32> to vector<8x1xf32>
    %cst_3 = arith.constant 3.200000e+01 : f32
    %8 = vector.broadcast %cst_3 : f32 to vector<8x1xf32>
    %9 = arith.divf %7, %8 : vector<8x1xf32>
    %10 = arith.mulf %4, %4 : vector<8x1xf32>
    %11 = arith.subf %9, %10 : vector<8x1xf32>
    %cst_4 = arith.constant 0.000000e+00 : f32
    %12 = vector.broadcast %cst_4 : f32 to vector<8x1xf32>
    %13 = arith.maximumf %11, %12 : vector<8x1xf32>
    %cst_5 = arith.constant 9.99999997E-7 : f32
    %14 = vector.broadcast %cst_5 : f32 to vector<8x1xf32>
    %15 = arith.addf %13, %14 : vector<8x1xf32>
    %16 = math.rsqrt %15 : vector<8x1xf32>
    %17 = vector.broadcast %4 : vector<8x1xf32> to vector<8x32xf32>
    %18 = arith.subf %0, %17 : vector<8x32xf32>
    %19 = vector.broadcast %16 : vector<8x1xf32> to vector<8x32xf32>
    %20 = arith.mulf %18, %19 : vector<8x32xf32>
    %c0_6 = arith.constant 0 : index
    %c0_7 = arith.constant 0 : index
    %21 = vector.load %arg2[%c0_6, %c0_7] : memref<32x64xf32, #tpu.memory_space<vmem>>, vector<32x64xf32>
    %cst_8 = arith.constant dense<0.000000e+00> : vector<8x64xf32>
    %22 = tpu.matmul %20, %21, %cst_8 {dimension_numbers = #tpu.dot_dimension_numbers<[1], [0], [0], [1], [0, 0, 1, 1], [], []>} : vector<8x32xf32>, vector<32x64xf32>, vector<8x64xf32> -> vector<8x64xf32>
    %c0_9 = arith.constant 0 : index
    %c0_10 = arith.constant 0 : index
    %23 = vector.load %arg3[%c0_9, %c0_10] : memref<1x64xf32, #tpu.memory_space<vmem>>, vector<1x64xf32>
    %24 = vector.broadcast %23 : vector<1x64xf32> to vector<8x64xf32>
    %25 = arith.addf %22, %24 : vector<8x64xf32>
    %c0_11 = arith.constant 0 : index
    %c0_12 = arith.constant 0 : index
    %26 = vector.load %arg4[%c0_11, %c0_12] : memref<8x64xf32, #tpu.memory_space<vmem>>, vector<8x64xf32>
    tpu.vector_store %arg4[%c0_11, %c0_12], %25 {strides = array<i32>} : memref<8x64xf32, #tpu.memory_space<vmem>>, vector<8x64xf32>,
    return
  }
  func.func @transform_0(%arg0: i32) -> (i32, i32) {
    %c0_i32 = arith.constant 0 : i32
    %c0_i32_0 = arith.constant 0 : i32
    return %arg0, %c0_i32 : i32, i32
  }
  func.func @transform_1(%arg0: i32) -> (i32, i32) {
    %c0_i32 = arith.constant 0 : i32
    %c0_i32_0 = arith.constant 0 : i32
    %c0_i32_1 = arith.constant 0 : i32
    return %c0_i32, %c0_i32_0 : i32, i32
  }
  func.func @transform_2(%arg0: i32) -> (i32, i32) {
    %c0_i32 = arith.constant 0 : i32
    %c0_i32_0 = arith.constant 0 : i32
    %c0_i32_1 = arith.constant 0 : i32
    return %c0_i32, %c0_i32_0 : i32, i32
  }
  func.func @transform_3(%arg0: i32) -> (i32, i32) {
    %c0_i32 = arith.constant 0 : i32
    %c0_i32_0 = arith.constant 0 : i32
    return %arg0, %c0_i32 : i32, i32
  }
}

module attributes {stable_mosaic.version = 11 : i64} {
  func.func @_final_layer_kernel(%arg0: i32, %arg1: memref<8x32xf32, #tpu.memory_space<vmem>>, %arg2: memref<32x64xf32, #tpu.memory_space<vmem>>, %arg3: memref<1x64xf32, #tpu.memory_space<vmem>>, %arg4: memref<8x64xf32, #tpu.memory_space<vmem>>) attributes {dimension_semantics = [#tpu.dimension_semantics<parallel>], iteration_bounds = array<i64: 2>, scalar_prefetch = 0 : i64, scratch_operands = 0 : i64, tpu.core_type = #tpu.core_type<tc>, window_params = [{transform_indices = @transform_0, window_bounds = array<i64: 8, 32>}, {pipeline_mode = #tpu.pipeline_mode<synchronous>, transform_indices = @transform_1, window_bounds = array<i64: 32, 64>}, {pipeline_mode = #tpu.pipeline_mode<synchronous>, transform_indices = @transform_2, window_bounds = array<i64: 1, 64>}, {transform_indices = @transform_3, window_bounds = array<i64: 8, 64>}]} {
    %c0 = arith.constant 0 : index
    %c0_0 = arith.constant 0 : index
    %0 = vector.load %arg1[%c0, %c0_0] : memref<8x32xf32, #tpu.memory_space<vmem>>, vector<8x32xf32>
    %cst = arith.constant dense<0.000000e+00> : vector<8xf32>
    %1 = vector.multi_reduction <add>, %0, %cst [1] : vector<8x32xf32> to vector<8xf32>
    %2 = vector.shape_cast %1 : vector<8xf32> to vector<8x1xf32>
    %cst_1 = arith.constant 3.200000e+01 : f32
    %3 = vector.broadcast %cst_1 : f32 to vector<8x1xf32>
    %4 = arith.divf %2, %3 : vector<8x1xf32>
    %5 = arith.mulf %0, %0 : vector<8x32xf32>
    %cst_2 = arith.constant dense<0.000000e+00> : vector<8xf32>
    %6 = vector.multi_reduction <add>, %5, %cst_2 [1] : vector<8x32xf32> to vector<8xf32>
    %7 = vector.shape_cast %6 : vector<8xf32> to vector<8x1xf32>
    %cst_3 = arith.constant 3.200000e+01 : f32
    %8 = vector.broadcast %cst_3 : f32 to vector<8x1xf32>
    %9 = arith.divf %7, %8 : vector<8x1xf32>
    %10 = arith.mulf %4, %4 : vector<8x1xf32>
    %11 = arith.subf %9, %10 : vector<8x1xf32>
    %cst_4 = arith.constant 0.000000e+00 : f32
    %12 = vector.broadcast %cst_4 : f32 to vector<8x1xf32>
    %13 = arith.maximumf %11, %12 : vector<8x1xf32>
    %cst_5 = arith.constant 9.99999997E-7 : f32
    %14 = vector.broadcast %cst_5 : f32 to vector<8x1xf32>
    %15 = arith.addf %13, %14 : vector<8x1xf32>
    %16 = math.rsqrt %15 : vector<8x1xf32>
    %17 = vector.broadcast %4 : vector<8x1xf32> to vector<8x32xf32>
    %18 = arith.subf %0, %17 : vector<8x32xf32>
    %19 = vector.broadcast %16 : vector<8x1xf32> to vector<8x32xf32>
    %20 = arith.mulf %18, %19 : vector<8x32xf32>
    %c0_6 = arith.constant 0 : index
    %c0_7 = arith.constant 0 : index
    %21 = vector.load %arg2[%c0_6, %c0_7] : memref<32x64xf32, #tpu.memory_space<vmem>>, vector<32x64xf32>
    %cst_8 = arith.constant dense<0.000000e+00> : vector<8x64xf32>
    %22 = tpu.matmul %20, %21, %cst_8 {dimension_numbers = #tpu.dot_dimension_numbers<[1], [0], [0], [1], [0, 0, 1, 1], [], []>} : vector<8x32xf32>, vector<32x64xf32>, vector<8x64xf32> -> vector<8x64xf32>
    %c0_9 = arith.constant 0 : index
    %c0_10 = arith.constant 0 : index
    %23 = vector.load %arg3[%c0_9, %c0_10] : memref<1x64xf32, #tpu.memory_space<vmem>>, vector<1x64xf32>
    %24 = vector.broadcast %23 : vector<1x64xf32> to vector<8x64xf32>
    %25 = arith.addf %22, %24 : vector<8x64xf32>
    %c0_11 = arith.constant 0 : index
    %c0_12 = arith.constant 0 : index
    %26 = vector.load %arg4[%c0_11, %c0_12] : memref<8x64xf32, #tpu.memory_space<vmem>>, vector<8x64xf32>
    tpu.vector_store %arg4[%c0_11, %c0_12], %25 {strides = array<i32>} : memref<8x64xf32, #tpu.memory_space<vmem>>, vector<8x64xf32>,
    return
  }
  func.func @transform_0(%arg0: i32) -> (i32, i32) {
    %c0_i32 = arith.constant 0 : i32
    %c0_i32_0 = arith.constant 0 : i32
    return %arg0, %c0_i32 : i32, i32
  }
  func.func @transform_1(%arg0: i32) -> (i32, i32) {
    %c0_i32 = arith.constant 0 : i32
    %c0_i32_0 = arith.constant 0 : i32
    %c0_i32_1 = arith.constant 0 : i32
    return %c0_i32, %c0_i32_0 : i32, i32
  }
  func.func @transform_2(%arg0: i32) -> (i32, i32) {
    %c0_i32 = arith.constant 0 : i32
    %c0_i32_0 = arith.constant 0 : i32
    %c0_i32_1 = arith.constant 0 : i32
    return %c0_i32, %c0_i32_0 : i32, i32
  }
  func.func @transform_3(%arg0: i32) -> (i32, i32) {
    %c0_i32 = arith.constant 0 : i32
    %c0_i32_0 = arith.constant 0 : i32
    return %arg0, %c0_i32 : i32, i32
  }
}

</mosaic_0001>

<bundles_post_ra>
// kernel: tpu_custom_call.1
= control target key start
LH: loop header
LB: loop body
LE: loop exit
PB: predicated region body
PF: predicated region fallthrough
CT: control target
= control target key end

     0   :  { %8 = vsyncpa [#allocation3], 0  ;;  %s866_s0 = inlined_call_operand.hbm [shape: f32[16,32], index: 0, kind: input, shape index: {}]   ;;  %s867_s1 = inlined_call_operand.hbm [shape: f32[32,64], index: 1, kind: input, shape index: {}]   ;;  %s868_s2 = inlined_call_operand.vmem [shape: f32[1,64], index: 2, kind: input, shape index: {}]   ;;  %s869_s3 = inlined_call_operand.hbm [shape: f32[16,64], index: 3, kind: output, shape index: {}]  }
   0x1   :  { %10 = vsyncpa [#allocation3 + $0x1], 0 }
   0x2   :  { %11 = vsyncpa [#allocation6], 0 }
   0x3   :  { %12 = vsyncpa [#allocation4], 0 }
   0x4   :  { %14 = vsyncpa [#allocation4 + $0x1], 0  ;;  %s660_s12 = smov 0   ;;  %s662_s13 = smov 0  }
   0x5   :  { %s664_s14 = smov 0   ;;  %s666_s15 = smov 0  }
   0x6 LB: > { %s681_s16 = sadd.s32 4294967295, %s630_s15   ;;  %s400_s17 = sadd.s32 4294967294, %s630_s15   ;;  %s630_s15 = sphi %s666_s15, %s889_s15   ;;  %s626_s14 = sphi %s664_s14, %s888_s14   ;;  %s622_s13 = sphi %s662_s13, %s887_s13   ;;  %s618_s12 = sphi %s660_s12, %s886_s12  }
   0x7   : > { %p40_p0 = scmp.ne.s32.totalorder %s622_s13, %s618_s12  ;;  %p870_p1 = scmp.eq.s32.totalorder %s681_s16, 0 }
   0x8   : > { %p112_p3 = scmp.eq.s32.totalorder %s400_s17, 1  ;;  %p401_p5 = scmp.ge.s32.totalorder %s630_s15, 1 }
   0x9   : > { %p690_p4 = por %p870_p1, %p40_p0  ;;  %p119_p7 = scmp.lt.s32.totalorder %s630_s15, 3 }
   0xa   : > { %p695_p6 = por %p112_p3, %p40_p0  ;;  %s632_s21 = smov [#allocation5]  }
   0xb   : > { %s873_s18 = scalar_select %p690_p4, 1, 0 }
   0xc   : > { %s874_s19 = scalar_select %p695_p6, 1, 0 }
   0xd   : > { %p700_p8 = pnand %p401_p5, %p119_p7  ;;  %s131_s22 = sshll.u32 %s632_s21, 4  ;;  %s704_s22 = int_to_ptr.vmem [resolvable:$true] %s131_s22 }
   0xe   : > { %s716_s24 = sadd.s32 1, %s630_s15   ;;  %s27_s25 = sadd.s32 1, %s626_s14 }
   0xf   : > { %s875_s20 = scalar_select %p700_p8, 1, 0 }
  0x10   : > { %p446_p9 = pneg %p700_p8  ;;  %s24_s26 = ssub.s32 %s630_s15, %s716_s24 }
  0x11   : > { %s502_s29 = scalar_lea.hbm %s867_s1, 512 }
  0x12   : > { %p711_p11 = pnand %p446_p9, %p870_p1  ;;  %p503_p12 = scmp.ne.s32.totalorder %s867_s1, %s502_s29 }
  0x13   : > { %p509_p5 = scmp.lt.u32.totalorder %s502_s29, %s867_s1 }
  0x14   : > { %p504_p13 = pneg %p711_p11 }
  0x16   : > { %p505_p0 = pnand %p504_p13, %p503_p12 }
  0x18   : > { %p506_p3 = pneg %p505_p0 }
  0x1a   : > { %p511_p7 = pnand %p509_p5, %p506_p3 }
  0x1c   : > { %514 = shalt.err (!%p511_p7)
}
  0x1d   : > { %s515_s7 = scalar_lea.vmem %s704_s22, 512  ;;  %p523_p2 = scmp.lt.s32.totalorder %s704_s22, %s704_s22 }
  0x1e   : > { %p516_p9 = scmp.ne.s32.totalorder %s704_s22, %s515_s7  ;;  %p524_p6 = scmp.lt.s32.totalorder %s515_s7, %s515_s7 }
  0x20   : > { %p518_p10 = pnand %p516_p9, %p504_p13  ;;  %p525_p4 = por %p524_p6, %p523_p2 }
  0x22   : > { %p519_p1 = pneg %p518_p10 }
  0x24   : > { %p526_p8 = pnand %p525_p4, %p519_p1 }
  0x26   : > { %529 = shalt.err (!%p526_p8)
}
  0x27   : > { %s633_s8 = smov 128   ;;  %s634_s9 = smov 8  }
  0x28   : > { %449 = dma.hbm_to_vmem [thread:$0]  (!%p711_p11), %s867_s1, 512, %s704_s22, [#allocation6], %s633_s8, %s633_s8, %s634_s9  }
  0x29   : > { %p25_p2 = scmp.eq.s32.totalorder %s24_s26, 0  ;;  %p34_p1 = scmp.ne.s32.totalorder %s626_s14, %s622_s13 }
  0x2a   : > { %p35_p4 = scmp.eq.s32.totalorder %s630_s15, 0  ;;  %p459_p6 = scmp.lt.s32.totalorder %s630_s15, 2 }
  0x2b   : > { %s747_s17 = scalar_select %p25_p2, %s626_s14, %s27_s25  }
  0x2c   : > { %p36_p8 = por %p35_p4, %p34_p1  ;;  %p877_p10 = scmp.eq.s32.totalorder %s681_s16, 1 }
  0x2d   : > { %s148_s27 = sand.u32 1, %s626_s14   ;;  %s405_s28 = sshll.u32 %s630_s15, 7 }
  0x2e   : > { %p751_p12 = por %p877_p10, %p34_p1  ;;  %s404_s29 = sshll.u32 %s148_s27, 3 }
  0x2f   : > { %s760_s4 = scalar_lea.hbm %s866_s0, %s405_s28  ;;  %s152_s22 = scalar_lea.vmem [#allocation2], %s404_s29 }
  0x30   : > { %s159_s25 = sshll.u32 %s152_s22, 4  ;;  %p762_p11 = pnand %p459_p6, %p36_p8  ;;  %s766_s25 = int_to_ptr.vmem [resolvable:$true] %s159_s25 }
  0x31   : > { %s149_s5 = scalar_lea.sflag [#allocation3], %s148_s27  ;;  %s530_s6 = scalar_lea.hbm %s760_s4, 128 }
  0x32   : > { %p531_p13 = scmp.ne.s32.totalorder %s760_s4, %s530_s6  ;;  %p532_p0 = pneg %p762_p11 }
  0x33   : > { %s535_s9 = scalar_lea.hbm %s866_s0, 256  ;;  %p536_p7 = scmp.lt.u32.totalorder %s760_s4, %s866_s0 }
  0x34   : > { %p533_p3 = pnand %p532_p0, %p531_p13  ;;  %p537_p9 = scmp.lt.u32.totalorder %s535_s9, %s530_s6 }
  0x35   : > { %p539_p1 = scmp.lt.u32.totalorder %s530_s6, %s760_s4 }
  0x36   : > { %p534_p5 = pneg %p533_p3  ;;  %p538_p2 = por %p537_p9, %p536_p7 }
  0x38   : > { %p540_p4 = por %p539_p1, %p538_p2 }
  0x3a   : > { %p541_p6 = pnand %p540_p4, %p534_p5 }
  0x3c   : > { %544 = shalt.err (!%p541_p6)
}
  0x3d   : > { %s545_s27 = scalar_lea.vmem %s766_s25, 128  ;;  %s635_s28 = smov [#allocation2]  }
  0x3e   : > { %p546_p8 = scmp.ne.s32.totalorder %s766_s25, %s545_s27  ;;  %s550_s29 = sshll.u32 %s635_s28, 4  ;;  %s551_s29 = int_to_ptr.vmem [resolvable:$false] %s550_s29 }
  0x3f   : > { %s552_s23 = scalar_lea.vmem %s551_s29, 256  ;;  %p553_p3 = scmp.lt.s32.totalorder %s766_s25, %s551_s29 }
  0x40   : > { %p548_p10 = pnand %p546_p8, %p532_p0  ;;  %p554_p7 = scmp.lt.s32.totalorder %s552_s23, %s545_s27 }
  0x42   : > { %p549_p13 = pneg %p548_p10  ;;  %p555_p9 = por %p554_p7, %p553_p3 }
  0x44   : > { %p556_p2 = pnand %p555_p9, %p549_p13 }
  0x46   : > { %559 = shalt.err (!%p556_p2)
}
  0x47   : > { %453 = dma.hbm_to_vmem [thread:$0]  (!%p762_p11), %s760_s4, 128, %s766_s25, %s149_s5  }
  0x48   : > { %p880_p5 = scmp.ne.s32.totalorder %s875_s20, 0 }
  0x49   : > { %s796_s30 = sand.u32 (!%p880_p5), 1, %s622_s13   ;;  %p881_p0 = scmp.ne.s32.totalorder (!%p880_p5), %s873_s18, 0 }
  0x4a   : > { %168 = sbr.rel (%p880_p5) target bundleno = 482 (0x1e2), region = 32  ;;  %s407_s22 = sshll.u32 (!%p880_p5), %s796_s30, 3 }
  0x4b   : > { %s171_s6 = scalar_lea.sflag (!%p880_p5), [#allocation3], %s796_s30  ;;  %s174_s7 = scalar_lea.vmem (!%p880_p5), [#allocation2], %s407_s22 }
  0x51   : > { %605 = dma.done.wait (%p881_p0), %s171_s6, 128  }
  0x52   : > { %607 = vsyncadd (%p881_p0), %s171_s6, 4294967168  ;;  %p882_p11 = scmp.eq.s32.totalorder %s681_s16, 0 }
  0x54   : > { %609 = dma.done.wait (%p882_p11), [#allocation6], 512   ;;  %p883_p1 = pmov %p882_p11 }
  0x55   : > { %vm202_vm0 = vcmask 261120   ;;  %v201_v0 = vld [vmem:[%s174_s7] sm:$0xff]  ;;  %v220_v4 = vld [vmem:[#allocation5] sm:$0xff]  ;;  %v221_v5 = vld [vmem:[#allocation5 + $0x8] sm:$0xff]  ;;  %v636_v7 = vmov 0.0|0.0   ;;  %vm637_vm1 = vmmov 0  }
  0x56   : > { %611 = vsyncadd (%p883_p1), [#allocation6], 4294966784  ;;  %v203_v1 = vsel %vm202_vm0, %v201_v0, 0.0  ;;  %v208_v2 = vmul.f32 %v201_v0, %v201_v0  ;;  %v222_v6 = vld [vmem:[#allocation5 + $0x10] sm:$0xff]  ;;  %432 = vmatprep.subr.bf16.mxu0 %v636_v7  ;;  %v433_v8 = vpack.c.bf16 %v221_v5, %v220_v4  ;;  %v223_v9 = vld [vmem:[#allocation5 + $0x18] sm:$0xff]  ;;  %v638_v10 = vmov 0.0  }
  0x57   : > { %204 = vadd.xlane.f32.xlu0 %v203_v1  ;;  %429 = vmatprep.mubr.msk.f32.mxu0 %vm637_vm1, %v638_v10  ;;  %v436_v11 = vpack.c.bf16 %v223_v9, %v222_v6  ;;  %v410_v23 = vld [vmem:[%s868_s2] ss:$0 sm:$0xff]  ;;  %s413_s4 = sshll.u32 %s681_s16, 7  ;;  %s200_s25 = scalar_lea.vmem [#allocation7], %s407_s22  ;;  %vm304_vm2 = vcmask 523264  }
  0x58   : > { %v209_v3 = vsel %vm202_vm0, %v208_v2, 0.0  ;;  %434 = vmatpush3.bf16.msra.mxu0 %v433_v8  ;;  %s320_s26 = sshll.u32 %s200_s25, 4  ;;  %s822_s9 = scalar_lea.hbm %s869_s3, %s413_s4  ;;  %s824_s26 = int_to_ptr.vmem [resolvable:$true] %s320_s26 }
  0x59   : > { %435 = vmatprep.subr.bf16.mxu0 %v636_v7  ;;  %s307_s10 = scalar_lea.sflag [#allocation4], %s796_s30  ;;  %s560_s16 = scalar_lea.vmem %s824_s26, 128 }
  0x5a   : > { %p561_p4 = scmp.ne.s32.totalorder %s824_s26, %s560_s16  ;;  %s639_s11 = smov [#allocation7]  }
  0x5b   : > { %210 = vadd.xlane.f32.xlu0 %v209_v3  ;;  %s564_s27 = sshll.u32 %s639_s11, 4  ;;  %s565_s27 = int_to_ptr.vmem [resolvable:$false] %s564_s27 }
  0x5c   : > { %437 = vmatpush3.bf16.msra.mxu0 %v436_v11  ;;  %p562_p6 = pnand %p561_p4, %p751_p12  ;;  %s566_s28 = scalar_lea.vmem %s565_s27, 256 }
  0x5d   : > { %p567_p10 = scmp.lt.s32.totalorder %s824_s26, %s565_s27  ;;  %p568_p13 = scmp.lt.s32.totalorder %s566_s28, %s560_s16 }
  0x5e   : > { %p563_p8 = pneg %p562_p6 }
  0x5f   : > { %p569_p3 = por %p568_p13, %p567_p10 }
  0x61   : > { %p570_p7 = pnand %p569_p3, %p563_p8 }
  0xe4   : > { %v205_v12 = vpop.xlane.xlu0 %204 }
  0xe5   : > { %v207_v13 = vmul.f32 0.03125, %v205_v12 }
  0xe7   : > { %v213_v15 = vmul.f32 %v207_v13, %v207_v13  ;;  %v218_v20 = vsub.f32 %v201_v0, %v207_v13 }
  0xe8   : > { %v211_v14 = vpop.xlane.xlu0 %210 }
  0xe9   : > { %v212_v16 = vmul.f32 0.03125, %v211_v14 }
  0xeb   : > { %v214_v17 = vsub.f32 %v212_v16, %v213_v15 }
  0xed   : > { %v215_v18 = vmax.f32 %v214_v17, 0.0 }
  0xef   : > { %v216_v19 = vadd.f32 1e-06, %v215_v18 }
  0xf1   : > { %500 = vrsqrt.f32 %v216_v19 }
  0xfb   : > { %v501_v21 = vpop.eup %500 }
  0xfc   : > { %v219_v22 = vmul.f32 %v501_v21, %v218_v20 }
  0xfe   : > { %430 = vmatmul.mubr.msk.f32.vlgmr.msra.gmra.mrb[0].mxu0 %vm202_vm0, %v219_v22 }
 0x1d1   : > { %v300_v24 = vpop.f32.mrb[0].mxu0 }
 0x1d2   : > { %v301_v25 = vadd.f32 %v410_v23, %v300_v24  ;;  %v431_v26 = vpop.f32.mrb[1].mxu0 }
 0x1d4   : > { %305 = vst.msk [vmem:[%s200_s25] sm:$0xff] %vm304_vm2, %v301_v25 }
 0x1d5   : > { %573 = shalt.err (!%p570_p7)
}
 0x1d6   : > { %s574_s29 = scalar_lea.hbm %s822_s9, 128  ;;  %s578_s22 = scalar_lea.hbm %s869_s3, 256 }
 0x1d7   : > { %p575_p9 = scmp.ne.s32.totalorder %s822_s9, %s574_s29  ;;  %p579_p0 = scmp.lt.u32.totalorder %s822_s9, %s869_s3 }
 0x1d8   : > { %p580_p11 = scmp.lt.u32.totalorder %s578_s22, %s574_s29  ;;  %p582_p4 = scmp.lt.u32.totalorder %s574_s29, %s822_s9 }
 0x1d9   : > { %p576_p2 = pnand %p575_p9, %p751_p12 }
 0x1da   : > { %p581_p1 = por %p580_p11, %p579_p0 }
 0x1db   : > { %p577_p5 = pneg %p576_p2 }
 0x1dc   : > { %p583_p6 = por %p582_p4, %p581_p1 }
 0x1de   : > { %p584_p8 = pnand %p583_p6, %p577_p5 }
 0x1e0   : > { %587 = shalt.err (!%p584_p8)
}
 0x1e1   : > { %444 = dma.vmem_to_hbm [thread:$0]  (%p751_p12), %s824_s26, 128, %s822_s9, %s307_s10  }
 0x1e2 PF: > { %s332_s18 = sand.u32 1, %s618_s12   ;;  %p884_p10 = scmp.ne.s32.totalorder %s874_s19, 0 }
 0x1e3   : > { %p885_p13 = scmp.ge.s32.totalorder %s630_s15, 2  ;;  %s333_s20 = scalar_lea.sflag [#allocation4], %s332_s18 }
 0x1e5   : > { %p455_p3 = pnand %p885_p13, %p884_p10 }
 0x1e7   : > { %613 = dma.done.wait (!%p455_p3), %s333_s20, 128  }
 0x1e8   : > { %615 = vsyncadd (!%p455_p3), %s333_s20, 4294967168  ;;  %p17_p7 = scmp.ge.s32.totalorder %s716_s24, 4   ;;  %s886_s12 = smov %s622_s13 }
 0x1e9   : > { %s887_s13 = smov %s626_s14  ;;  %s888_s14 = smov %s747_s17 }
 0x1ea   : > { %s889_s15 = smov %s716_s24  ;;  %19 = sbr.rel (!%p17_p7) target bundleno = 6 (0x6), region = 81 }
 0x1f1   :  { %338 = vsyncpa [#allocation3], 1 }
 0x1f2   :  { %340 = vsyncpa [#allocation3 + $0x1], 1 }
 0x1f3   :  { %341 = vsyncpa [#allocation6], 1 }
 0x1f4   :  { %342 = vsyncpa [#allocation4], 1 }
 0x1f5   :  { %344 = vsyncpa [#allocation4 + $0x1], 1 }

// kernel: tpu_custom_call.1
= control target key start
LH: loop header
LB: loop body
LE: loop exit
PB: predicated region body
PF: predicated region fallthrough
CT: control target
= control target key end

     0   :  { %8 = vsyncpa [#allocation3], 0  ;;  %s866_s0 = inlined_call_operand.hbm [shape: f32[16,32], index: 0, kind: input, shape index: {}]   ;;  %s867_s1 = inlined_call_operand.hbm [shape: f32[32,64], index: 1, kind: input, shape index: {}]   ;;  %s868_s2 = inlined_call_operand.vmem [shape: f32[1,64], index: 2, kind: input, shape index: {}]   ;;  %s869_s3 = inlined_call_operand.hbm [shape: f32[16,64], index: 3, kind: output, shape index: {}]  }
   0x1   :  { %10 = vsyncpa [#allocation3 + $0x1], 0 }
   0x2   :  { %11 = vsyncpa [#allocation6], 0 }
   0x3   :  { %12 = vsyncpa [#allocation4], 0 }
   0x4   :  { %14 = vsyncpa [#allocation4 + $0x1], 0  ;;  %s660_s12 = smov 0   ;;  %s662_s13 = smov 0  }
   0x5   :  { %s664_s14 = smov 0   ;;  %s666_s15 = smov 0  }
   0x6 LB: > { %s681_s16 = sadd.s32 4294967295, %s630_s15   ;;  %s400_s17 = sadd.s32 4294967294, %s630_s15   ;;  %s630_s15 = sphi %s666_s15, %s889_s15   ;;  %s626_s14 = sphi %s664_s14, %s888_s14   ;;  %s622_s13 = sphi %s662_s13, %s887_s13   ;;  %s618_s12 = sphi %s660_s12, %s886_s12  }
   0x7   : > { %p40_p0 = scmp.ne.s32.totalorder %s622_s13, %s618_s12  ;;  %p870_p1 = scmp.eq.s32.totalorder %s681_s16, 0 }
   0x8   : > { %p112_p3 = scmp.eq.s32.totalorder %s400_s17, 1  ;;  %p401_p5 = scmp.ge.s32.totalorder %s630_s15, 1 }
   0x9   : > { %p690_p4 = por %p870_p1, %p40_p0  ;;  %p119_p7 = scmp.lt.s32.totalorder %s630_s15, 3 }
   0xa   : > { %p695_p6 = por %p112_p3, %p40_p0  ;;  %s632_s21 = smov [#allocation5]  }
   0xb   : > { %s873_s18 = scalar_select %p690_p4, 1, 0 }
   0xc   : > { %s874_s19 = scalar_select %p695_p6, 1, 0 }
   0xd   : > { %p700_p8 = pnand %p401_p5, %p119_p7  ;;  %s131_s22 = sshll.u32 %s632_s21, 4  ;;  %s704_s22 = int_to_ptr.vmem [resolvable:$true] %s131_s22 }
   0xe   : > { %s716_s24 = sadd.s32 1, %s630_s15   ;;  %s27_s25 = sadd.s32 1, %s626_s14 }
   0xf   : > { %s875_s20 = scalar_select %p700_p8, 1, 0 }
  0x10   : > { %p446_p9 = pneg %p700_p8  ;;  %s24_s26 = ssub.s32 %s630_s15, %s716_s24 }
  0x11   : > { %s502_s29 = scalar_lea.hbm %s867_s1, 512 }
  0x12   : > { %p711_p11 = pnand %p446_p9, %p870_p1  ;;  %p503_p12 = scmp.ne.s32.totalorder %s867_s1, %s502_s29 }
  0x13   : > { %p509_p5 = scmp.lt.u32.totalorder %s502_s29, %s867_s1 }
  0x14   : > { %p504_p13 = pneg %p711_p11 }
  0x16   : > { %p505_p0 = pnand %p504_p13, %p503_p12 }
  0x18   : > { %p506_p3 = pneg %p505_p0 }
  0x1a   : > { %p511_p7 = pnand %p509_p5, %p506_p3 }
  0x1c   : > { %514 = shalt.err (!%p511_p7)
}
  0x1d   : > { %s515_s7 = scalar_lea.vmem %s704_s22, 512  ;;  %p523_p2 = scmp.lt.s32.totalorder %s704_s22, %s704_s22 }
  0x1e   : > { %p516_p9 = scmp.ne.s32.totalorder %s704_s22, %s515_s7  ;;  %p524_p6 = scmp.lt.s32.totalorder %s515_s7, %s515_s7 }
  0x20   : > { %p518_p10 = pnand %p516_p9, %p504_p13  ;;  %p525_p4 = por %p524_p6, %p523_p2 }
  0x22   : > { %p519_p1 = pneg %p518_p10 }
  0x24   : > { %p526_p8 = pnand %p525_p4, %p519_p1 }
  0x26   : > { %529 = shalt.err (!%p526_p8)
}
  0x27   : > { %s633_s8 = smov 128   ;;  %s634_s9 = smov 8  }
  0x28   : > { %449 = dma.hbm_to_vmem [thread:$0]  (!%p711_p11), %s867_s1, 512, %s704_s22, [#allocation6], %s633_s8, %s633_s8, %s634_s9  }
  0x29   : > { %p25_p2 = scmp.eq.s32.totalorder %s24_s26, 0  ;;  %p34_p1 = scmp.ne.s32.totalorder %s626_s14, %s622_s13 }
  0x2a   : > { %p35_p4 = scmp.eq.s32.totalorder %s630_s15, 0  ;;  %p459_p6 = scmp.lt.s32.totalorder %s630_s15, 2 }
  0x2b   : > { %s747_s17 = scalar_select %p25_p2, %s626_s14, %s27_s25  }
  0x2c   : > { %p36_p8 = por %p35_p4, %p34_p1  ;;  %p877_p10 = scmp.eq.s32.totalorder %s681_s16, 1 }
  0x2d   : > { %s148_s27 = sand.u32 1, %s626_s14   ;;  %s405_s28 = sshll.u32 %s630_s15, 7 }
  0x2e   : > { %p751_p12 = por %p877_p10, %p34_p1  ;;  %s404_s29 = sshll.u32 %s148_s27, 3 }
  0x2f   : > { %s760_s4 = scalar_lea.hbm %s866_s0, %s405_s28  ;;  %s152_s22 = scalar_lea.vmem [#allocation2], %s404_s29 }
  0x30   : > { %s159_s25 = sshll.u32 %s152_s22, 4  ;;  %p762_p11 = pnand %p459_p6, %p36_p8  ;;  %s766_s25 = int_to_ptr.vmem [resolvable:$true] %s159_s25 }
  0x31   : > { %s149_s5 = scalar_lea.sflag [#allocation3], %s148_s27  ;;  %s530_s6 = scalar_lea.hbm %s760_s4, 128 }
  0x32   : > { %p531_p13 = scmp.ne.s32.totalorder %s760_s4, %s530_s6  ;;  %p532_p0 = pneg %p762_p11 }
  0x33   : > { %s535_s9 = scalar_lea.hbm %s866_s0, 256  ;;  %p536_p7 = scmp.lt.u32.totalorder %s760_s4, %s866_s0 }
  0x34   : > { %p533_p3 = pnand %p532_p0, %p531_p13  ;;  %p537_p9 = scmp.lt.u32.totalorder %s535_s9, %s530_s6 }
  0x35   : > { %p539_p1 = scmp.lt.u32.totalorder %s530_s6, %s760_s4 }
  0x36   : > { %p534_p5 = pneg %p533_p3  ;;  %p538_p2 = por %p537_p9, %p536_p7 }
  0x38   : > { %p540_p4 = por %p539_p1, %p538_p2 }
  0x3a   : > { %p541_p6 = pnand %p540_p4, %p534_p5 }
  0x3c   : > { %544 = shalt.err (!%p541_p6)
}
  0x3d   : > { %s545_s27 = scalar_lea.vmem %s766_s25, 128  ;;  %s635_s28 = smov [#allocation2]  }
  0x3e   : > { %p546_p8 = scmp.ne.s32.totalorder %s766_s25, %s545_s27  ;;  %s550_s29 = sshll.u32 %s635_s28, 4  ;;  %s551_s29 = int_to_ptr.vmem [resolvable:$false] %s550_s29 }
  0x3f   : > { %s552_s23 = scalar_lea.vmem %s551_s29, 256  ;;  %p553_p3 = scmp.lt.s32.totalorder %s766_s25, %s551_s29 }
  0x40   : > { %p548_p10 = pnand %p546_p8, %p532_p0  ;;  %p554_p7 = scmp.lt.s32.totalorder %s552_s23, %s545_s27 }
  0x42   : > { %p549_p13 = pneg %p548_p10  ;;  %p555_p9 = por %p554_p7, %p553_p3 }
  0x44   : > { %p556_p2 = pnand %p555_p9, %p549_p13 }
  0x46   : > { %559 = shalt.err (!%p556_p2)
}
  0x47   : > { %453 = dma.hbm_to_vmem [thread:$0]  (!%p762_p11), %s760_s4, 128, %s766_s25, %s149_s5  }
  0x48   : > { %p880_p5 = scmp.ne.s32.totalorder %s875_s20, 0 }
  0x49   : > { %s796_s30 = sand.u32 (!%p880_p5), 1, %s622_s13   ;;  %p881_p0 = scmp.ne.s32.totalorder (!%p880_p5), %s873_s18, 0 }
  0x4a   : > { %168 = sbr.rel (%p880_p5) target bundleno = 482 (0x1e2), region = 32  ;;  %s407_s22 = sshll.u32 (!%p880_p5), %s796_s30, 3 }
  0x4b   : > { %s171_s6 = scalar_lea.sflag (!%p880_p5), [#allocation3], %s796_s30  ;;  %s174_s7 = scalar_lea.vmem (!%p880_p5), [#allocation2], %s407_s22 }
  0x51   : > { %605 = dma.done.wait (%p881_p0), %s171_s6, 128  }
  0x52   : > { %607 = vsyncadd (%p881_p0), %s171_s6, 4294967168  ;;  %p882_p11 = scmp.eq.s32.totalorder %s681_s16, 0 }
  0x54   : > { %609 = dma.done.wait (%p882_p11), [#allocation6], 512   ;;  %p883_p1 = pmov %p882_p11 }
  0x55   : > { %vm202_vm0 = vcmask 261120   ;;  %v201_v0 = vld [vmem:[%s174_s7] sm:$0xff]  ;;  %v220_v4 = vld [vmem:[#allocation5] sm:$0xff]  ;;  %v221_v5 = vld [vmem:[#allocation5 + $0x8] sm:$0xff]  ;;  %v636_v7 = vmov 0.0|0.0   ;;  %vm637_vm1 = vmmov 0  }
  0x56   : > { %611 = vsyncadd (%p883_p1), [#allocation6], 4294966784  ;;  %v203_v1 = vsel %vm202_vm0, %v201_v0, 0.0  ;;  %v208_v2 = vmul.f32 %v201_v0, %v201_v0  ;;  %v222_v6 = vld [vmem:[#allocation5 + $0x10] sm:$0xff]  ;;  %432 = vmatprep.subr.bf16.mxu0 %v636_v7  ;;  %v433_v8 = vpack.c.bf16 %v221_v5, %v220_v4  ;;  %v223_v9 = vld [vmem:[#allocation5 + $0x18] sm:$0xff]  ;;  %v638_v10 = vmov 0.0  }
  0x57   : > { %204 = vadd.xlane.f32.xlu0 %v203_v1  ;;  %429 = vmatprep.mubr.msk.f32.mxu0 %vm637_vm1, %v638_v10  ;;  %v436_v11 = vpack.c.bf16 %v223_v9, %v222_v6  ;;  %v410_v23 = vld [vmem:[%s868_s2] ss:$0 sm:$0xff]  ;;  %s413_s4 = sshll.u32 %s681_s16, 7  ;;  %s200_s25 = scalar_lea.vmem [#allocation7], %s407_s22  ;;  %vm304_vm2 = vcmask 523264  }
  0x58   : > { %v209_v3 = vsel %vm202_vm0, %v208_v2, 0.0  ;;  %434 = vmatpush3.bf16.msra.mxu0 %v433_v8  ;;  %s320_s26 = sshll.u32 %s200_s25, 4  ;;  %s822_s9 = scalar_lea.hbm %s869_s3, %s413_s4  ;;  %s824_s26 = int_to_ptr.vmem [resolvable:$true] %s320_s26 }
  0x59   : > { %435 = vmatprep.subr.bf16.mxu0 %v636_v7  ;;  %s307_s10 = scalar_lea.sflag [#allocation4], %s796_s30  ;;  %s560_s16 = scalar_lea.vmem %s824_s26, 128 }
  0x5a   : > { %p561_p4 = scmp.ne.s32.totalorder %s824_s26, %s560_s16  ;;  %s639_s11 = smov [#allocation7]  }
  0x5b   : > { %210 = vadd.xlane.f32.xlu0 %v209_v3  ;;  %s564_s27 = sshll.u32 %s639_s11, 4  ;;  %s565_s27 = int_to_ptr.vmem [resolvable:$false] %s564_s27 }
  0x5c   : > { %437 = vmatpush3.bf16.msra.mxu0 %v436_v11  ;;  %p562_p6 = pnand %p561_p4, %p751_p12  ;;  %s566_s28 = scalar_lea.vmem %s565_s27, 256 }
  0x5d   : > { %p567_p10 = scmp.lt.s32.totalorder %s824_s26, %s565_s27  ;;  %p568_p13 = scmp.lt.s32.totalorder %s566_s28, %s560_s16 }
  0x5e   : > { %p563_p8 = pneg %p562_p6 }
  0x5f   : > { %p569_p3 = por %p568_p13, %p567_p10 }
  0x61   : > { %p570_p7 = pnand %p569_p3, %p563_p8 }
  0xe4   : > { %v205_v12 = vpop.xlane.xlu0 %204 }
  0xe5   : > { %v207_v13 = vmul.f32 0.03125, %v205_v12 }
  0xe7   : > { %v213_v15 = vmul.f32 %v207_v13, %v207_v13  ;;  %v218_v20 = vsub.f32 %v201_v0, %v207_v13 }
  0xe8   : > { %v211_v14 = vpop.xlane.xlu0 %210 }
  0xe9   : > { %v212_v16 = vmul.f32 0.03125, %v211_v14 }
  0xeb   : > { %v214_v17 = vsub.f32 %v212_v16, %v213_v15 }
  0xed   : > { %v215_v18 = vmax.f32 %v214_v17, 0.0 }
  0xef   : > { %v216_v19 = vadd.f32 1e-06, %v215_v18 }
  0xf1   : > { %500 = vrsqrt.f32 %v216_v19 }
  0xfb   : > { %v501_v21 = vpop.eup %500 }
  0xfc   : > { %v219_v22 = vmul.f32 %v501_v21, %v218_v20 }
  0xfe   : > { %430 = vmatmul.mubr.msk.f32.vlgmr.msra.gmra.mrb[0].mxu0 %vm202_vm0, %v219_v22 }
 0x1d1   : > { %v300_v24 = vpop.f32.mrb[0].mxu0 }
 0x1d2   : > { %v301_v25 = vadd.f32 %v410_v23, %v300_v24  ;;  %v431_v26 = vpop.f32.mrb[1].mxu0 }
 0x1d4   : > { %305 = vst.msk [vmem:[%s200_s25] sm:$0xff] %vm304_vm2, %v301_v25 }
 0x1d5   : > { %573 = shalt.err (!%p570_p7)
}
 0x1d6   : > { %s574_s29 = scalar_lea.hbm %s822_s9, 128  ;;  %s578_s22 = scalar_lea.hbm %s869_s3, 256 }
 0x1d7   : > { %p575_p9 = scmp.ne.s32.totalorder %s822_s9, %s574_s29  ;;  %p579_p0 = scmp.lt.u32.totalorder %s822_s9, %s869_s3 }
 0x1d8   : > { %p580_p11 = scmp.lt.u32.totalorder %s578_s22, %s574_s29  ;;  %p582_p4 = scmp.lt.u32.totalorder %s574_s29, %s822_s9 }
 0x1d9   : > { %p576_p2 = pnand %p575_p9, %p751_p12 }
 0x1da   : > { %p581_p1 = por %p580_p11, %p579_p0 }
 0x1db   : > { %p577_p5 = pneg %p576_p2 }
 0x1dc   : > { %p583_p6 = por %p582_p4, %p581_p1 }
 0x1de   : > { %p584_p8 = pnand %p583_p6, %p577_p5 }
 0x1e0   : > { %587 = shalt.err (!%p584_p8)
}
 0x1e1   : > { %444 = dma.vmem_to_hbm [thread:$0]  (%p751_p12), %s824_s26, 128, %s822_s9, %s307_s10  }
 0x1e2 PF: > { %s332_s18 = sand.u32 1, %s618_s12   ;;  %p884_p10 = scmp.ne.s32.totalorder %s874_s19, 0 }
 0x1e3   : > { %p885_p13 = scmp.ge.s32.totalorder %s630_s15, 2  ;;  %s333_s20 = scalar_lea.sflag [#allocation4], %s332_s18 }
 0x1e5   : > { %p455_p3 = pnand %p885_p13, %p884_p10 }
 0x1e7   : > { %613 = dma.done.wait (!%p455_p3), %s333_s20, 128  }
 0x1e8   : > { %615 = vsyncadd (!%p455_p3), %s333_s20, 4294967168  ;;  %p17_p7 = scmp.ge.s32.totalorder %s716_s24, 4   ;;  %s886_s12 = smov %s622_s13 }
 0x1e9   : > { %s887_s13 = smov %s626_s14  ;;  %s888_s14 = smov %s747_s17 }
 0x1ea   : > { %s889_s15 = smov %s716_s24  ;;  %19 = sbr.rel (!%p17_p7) target bundleno = 6 (0x6), region = 81 }
 0x1f1   :  { %338 = vsyncpa [#allocation3], 1 }
 0x1f2   :  { %340 = vsyncpa [#allocation3 + $0x1], 1 }
 0x1f3   :  { %341 = vsyncpa [#allocation6], 1 }
 0x1f4   :  { %342 = vsyncpa [#allocation4], 1 }
 0x1f5   :  { %344 = vsyncpa [#allocation4 + $0x1], 1 }

</bundles_post_ra>
